<compile_context>
chip_gen: v6e
topology: v6e:2x2x1
jax: 0.10.0
libtpu: 0.0.40
codegen_flags: <defaults>
</compile_context>

<pallas_src>
import functools

import jax
import jax.numpy as jnp
from jax.experimental import pallas as pl
from jax.experimental.pallas import tpu as pltpu

HIDDEN = 64  # matches nn.Conv1d(feature_dim // 2, 64, ...) in the module


def _choose_seg(batch, length):
    """Smallest per-sample segment width (multiple of 8, >= L+1) such that
    batch*seg is a multiple of 128: lane-dense folded slab, with at least one
    guaranteed-zero column between samples for the conv halo."""
    seg = ((length + 1 + 7) // 8) * 8
    while (batch * seg) % 128 != 0:
        seg += 8
    return seg


# ----------------------------------------------------------------------------
# Pallas kernel (gridless; everything lives in VMEM / vregs)
# ----------------------------------------------------------------------------
def coupling_kernel(x1_ref, x2_ref,
                    w1_ref, b1_ref, w2_ref, b2_ref,
                    w3s_ref, b3s_ref, w3t_ref, b3t_ref,
                    y2_ref, ld_ref, *, batch, length, seg):
    """Refs (all VMEM, f32):
      x1_ref, x2_ref : (half, N)     x halves as batch-folded slabs, N=batch*seg;
                                     valid data in cols [b*seg, b*seg+length)
      w*_ref         : (3, Cout, Cin)  tap-major conv weights (taps k=0,1,2)
      b*_ref         : (Cout, 1)       conv biases
      y2_ref         : (half, N)     transformed half (same slab layout)
      ld_ref         : (1, batch)    per-sample log|det J|
    """
    n = x1_ref.shape[1]

    # 0/1 mask over the valid columns of each sample segment (iota + compares
    # only).  Multiplying by it after each layer keeps the padding columns
    # exactly zero, which is what makes the roll-based conv halo correct.
    col = jax.lax.broadcasted_iota(jnp.int32, (1, n), 1)
    valid = (col >= 0) & (col < length)
    for b in range(1, batch):
        valid = valid | ((col >= b * seg) & (col < b * seg + length))
    validf = valid.astype(jnp.float32)                       # (1, N)

    def mask(v):                        # zero inter-sample padding columns
        return v * validf               # (rows,N)*(1,N): sublane broadcast, VPU

    def leaky(v):                       # LeakyReLU(0.2)
        return jnp.where(v > 0.0, v, 0.2 * v)

    def conv(h, w_ref, b_ref):
        # Conv1d(kernel=3, padding=1) over the batch-folded slab h: (Cin, N).
        # 3 accumulating MXU matmuls; the shifted operands come from XLU
        # rolls.  Because h's padding columns are zero, the wrap-around across
        # sample boundaries reads exact zeros (the conv's zero padding).
        hl = pltpu.roll(h, 1, axis=1)        # h[:, j-1]   (tap k=0)
        hr = pltpu.roll(h, n - 1, axis=1)    # h[:, j+1]   (tap k=2)
        out = jnp.dot(w_ref[0], hl, preferred_element_type=jnp.float32)
        out = out + jnp.dot(w_ref[1], h, preferred_element_type=jnp.float32)
        out = out + jnp.dot(w_ref[2], hr, preferred_element_type=jnp.float32)
        return out + b_ref[...]

    # 3-layer conv net on x1, batch folded into the lane dimension
    # (3 matmul pushes per layer for ALL samples).
    h = mask(x1_ref[...])
    h = mask(leaky(conv(h, w1_ref, b1_ref)))
    h = mask(leaky(conv(h, w2_ref, b2_ref)))
    s = mask(jnp.tanh(conv(h, w3s_ref, b3s_ref)))            # (half, N)
    t = conv(h, w3t_ref, b3t_ref)                            # (half, N)

    # Affine coupling: one lane-dense full-width store.
    y2_ref[...] = (x2_ref[...] * jnp.exp(s) + t).astype(y2_ref.dtype)

    # log|det J| = sum(s) per sample: fold the segmented lane reduction into
    # one tiny selector matmul so all log-dets land with a single store.
    col_sum = jnp.sum(s, axis=0, keepdims=True)              # (1, N)
    n_i = jax.lax.broadcasted_iota(jnp.int32, (n, batch), 0)
    b_i = jax.lax.broadcasted_iota(jnp.int32, (n, batch), 1)
    sel = ((n_i >= b_i * seg) & (n_i < b_i * seg + seg)).astype(jnp.float32)
    ld_ref[...] = jnp.dot(col_sum, sel, preferred_element_type=jnp.float32)


# ----------------------------------------------------------------------------
# Parameters (deterministic, PyTorch Conv1d default-style uniform init)
# ----------------------------------------------------------------------------
def init_params(key, feature_dim, hidden=HIDDEN):
    half = feature_dim // 2

    def conv_init(k, cin, cout, ksz=3):
        bound = 1.0 / (cin * ksz) ** 0.5
        kw, kb = jax.random.split(k)
        w = jax.random.uniform(kw, (cout, cin, ksz), jnp.float32, -bound, bound)
        b = jax.random.uniform(kb, (cout,), jnp.float32, -bound, bound)
        return w, b

    k1, k2, k3 = jax.random.split(key, 3)
    w1, b1 = conv_init(k1, half, hidden)
    w2, b2 = conv_init(k2, hidden, hidden)
    w3, b3 = conv_init(k3, hidden, feature_dim)
    return (w1, b1, w2, b2, w3, b3)


def prepare_params(params):
    """One-time weight re-layout (call once at init, never per forward):
    Conv1d weight (Cout, Cin, 3) -> tap-major (3, Cout, Cin) so each tap is a
    clean leading-axis load; conv3 is split into its s/t output halves so the
    kernel never slices matmul results; biases -> (Cout, 1) columns."""
    w1, b1, w2, b2, w3, b3 = params
    half = w3.shape[0] // 2

    def taps(w):
        return jnp.transpose(w, (2, 0, 1))          # (3, Cout, Cin)

    def colv(b):
        return b.reshape(-1, 1)                     # (Cout, 1)

    return (taps(w1), colv(b1), taps(w2), colv(b2),
            taps(w3[:half]), colv(b3[:half]),
            taps(w3[half:]), colv(b3[half:]))


# ----------------------------------------------------------------------------
# Wrapper: single gridless pallas_call; layout plumbing stays in XLA
# ----------------------------------------------------------------------------
def coupling_forward(x, prepared):
    """x: (B, feature_dim, L) float32 (PyTorch NCL). Returns (y, log_det)."""
    batch, feat, length = x.shape
    assert feat % 2 == 0, "feature_dim must be even"
    half = feat // 2
    seg = _choose_seg(batch, length)
    n = batch * seg

    # Layout plumbing (XLA, outside the kernel): channels-major, batch-folded,
    # lane-padded slabs so every in-kernel access is full-width and unmasked.
    x_cbl = jnp.transpose(x, (1, 0, 2)).astype(jnp.float32)        # (C, B, L)
    x_slab = jnp.pad(x_cbl, ((0, 0), (0, 0), (0, seg - length)))   # (C, B, seg)
    x_slab = x_slab.reshape(feat, n)
    x1s, x2s = x_slab[:half], x_slab[half:]

    vmem = pl.BlockSpec(memory_space=pltpu.MemorySpace.VMEM)
    kernel = functools.partial(coupling_kernel, batch=batch, length=length,
                               seg=seg)

    y2s, ld = pl.pallas_call(
        kernel,
        out_shape=(jax.ShapeDtypeStruct((half, n), jnp.float32),
                   jax.ShapeDtypeStruct((1, batch), jnp.float32)),
        in_specs=[vmem] * 10,
        out_specs=(vmem, vmem),
    )(x1s, x2s, *prepared)

    # Undo the slab layout; the untouched x1 half passes through OUTSIDE the
    # kernel (no round-trip of identity data through VMEM).
    y2 = jnp.transpose(y2s.reshape(half, batch, seg)[:, :, :length], (1, 0, 2))
    y = jnp.concatenate([x[:, :half, :], y2.astype(x.dtype)], axis=1)
    return y, ld[0]


# ----------------------------------------------------------------------------
# Pure-JAX reference (correctness check only)
# ----------------------------------------------------------------------------
def reference_forward(x, params):
    w1, b1, w2, b2, w3, b3 = params
    half = x.shape[1] // 2
    x1, x2 = x[:, :half, :], x[:, half:, :]

    def conv(h, w, b):
        out = jax.lax.conv_general_dilated(
            h, w, window_strides=(1,), padding=((1, 1),),
            dimension_numbers=('NCH', 'OIH', 'NCH'))
        return out + b[None, :, None]

    def leaky(v):
        return jnp.where(v > 0, v, 0.2 * v)

    st = conv(leaky(conv(leaky(conv(x1, w1, b1)), w2, b2)), w3, b3)
    s, t = st[:, :half, :], st[:, half:, :]
    s = jnp.tanh(s)
    y2 = x2 * jnp.exp(s) + t
    y = jnp.concatenate([x1, y2], axis=1)
    return y, jnp.sum(s, axis=(1, 2))


if __name__ == "__main__":
    key = jax.random.PRNGKey(0)
    kx, kp = jax.random.split(key)

    feature_dim, batch, length = 4, 2, 16
    x = jax.random.normal(kx, (batch, feature_dim, length), jnp.float32)
    params = init_params(kp, feature_dim)
    prepared = prepare_params(params)          # one-time weight re-layout

    fwd = jax.jit(coupling_forward)
    y, log_det = fwd(x, prepared)
    jax.block_until_ready((y, log_det))

    y_exp, ld_exp = reference_forward(x, params)
    assert y.shape == (batch, feature_dim, length)
    assert log_det.shape == (batch,)
    assert jnp.allclose(y, y_exp, atol=1e-4, rtol=1e-4)
    assert jnp.allclose(log_det, ld_exp, atol=1e-4, rtol=1e-4)

    print("KERNEL_OK")
</pallas_src>

<mosaic_0001>
module attributes {stable_mosaic.version = 11 : i64} {
  func.func @coupling_kernel(%arg0: memref<2x128xf32, #tpu.memory_space<vmem>>, %arg1: memref<2x128xf32, #tpu.memory_space<vmem>>, %arg2: memref<3x64x2xf32, #tpu.memory_space<vmem>>, %arg3: memref<64x1xf32, #tpu.memory_space<vmem>>, %arg4: memref<3x64x64xf32, #tpu.memory_space<vmem>>, %arg5: memref<64x1xf32, #tpu.memory_space<vmem>>, %arg6: memref<3x2x64xf32, #tpu.memory_space<vmem>>, %arg7: memref<2x1xf32, #tpu.memory_space<vmem>>, %arg8: memref<3x2x64xf32, #tpu.memory_space<vmem>>, %arg9: memref<2x1xf32, #tpu.memory_space<vmem>>, %arg10: memref<2x128xf32, #tpu.memory_space<vmem>>, %arg11: memref<1x2xf32, #tpu.memory_space<vmem>>) attributes {dimension_semantics = [], scalar_prefetch = 0 : i64, scratch_operands = 0 : i64, tpu.core_type = #tpu.core_type<tc>} {
    %0 = tpu.iota {dimensions = array<i32: 1>} : vector<1x128xi32>
    %c0_i32 = arith.constant 0 : i32
    %1 = vector.broadcast %c0_i32 : i32 to vector<1x128xi32>
    %2 = arith.cmpi sge, %0, %1 : vector<1x128xi32>
    %c16_i32 = arith.constant 16 : i32
    %3 = vector.broadcast %c16_i32 : i32 to vector<1x128xi32>
    %4 = arith.cmpi slt, %0, %3 : vector<1x128xi32>
    %5 = arith.andi %2, %4 : vector<1x128xi1>
    %c64_i32 = arith.constant 64 : i32
    %6 = vector.broadcast %c64_i32 : i32 to vector<1x128xi32>
    %7 = arith.cmpi sge, %0, %6 : vector<1x128xi32>
    %c80_i32 = arith.constant 80 : i32
    %8 = vector.broadcast %c80_i32 : i32 to vector<1x128xi32>
    %9 = arith.cmpi slt, %0, %8 : vector<1x128xi32>
    %10 = arith.andi %7, %9 : vector<1x128xi1>
    %11 = arith.ori %5, %10 : vector<1x128xi1>
    %12 = arith.extui %11 : vector<1x128xi1> to vector<1x128xi32>
    %13 = arith.sitofp %12 : vector<1x128xi32> to vector<1x128xf32>
    %c0 = arith.constant 0 : index
    %c0_0 = arith.constant 0 : index
    %14 = vector.load %arg0[%c0, %c0_0] : memref<2x128xf32, #tpu.memory_space<vmem>>, vector<2x128xf32>
    %15 = vector.broadcast %13 : vector<1x128xf32> to vector<2x128xf32>
    %16 = arith.mulf %14, %15 : vector<2x128xf32>
    %c1_i32 = arith.constant 1 : i32
    %17 = tpu.dynamic_rotate %16 by %c1_i32 dim 1 : vector<2x128xf32>, i32 -> vector<2x128xf32>
    %c127_i32 = arith.constant 127 : i32
    %18 = tpu.dynamic_rotate %16 by %c127_i32 dim 1 : vector<2x128xf32>, i32 -> vector<2x128xf32>
    %c0_1 = arith.constant 0 : index
    %c0_2 = arith.constant 0 : index
    %c0_3 = arith.constant 0 : index
    %19 = vector.load %arg2[%c0_1, %c0_2, %c0_3] : memref<3x64x2xf32, #tpu.memory_space<vmem>>, vector<1x64x2xf32>
    %20 = vector.shape_cast %19 : vector<1x64x2xf32> to vector<64x2xf32>
    %cst = arith.constant dense<0.000000e+00> : vector<64x128xf32>
    %21 = tpu.matmul %20, %17, %cst {dimension_numbers = #tpu.dot_dimension_numbers<[1], [0], [0], [1], [0, 0, 1, 1], [], []>} : vector<64x2xf32>, vector<2x128xf32>, vector<64x128xf32> -> vector<64x128xf32>
    %c1 = arith.constant 1 : index
    %c0_4 = arith.constant 0 : index
    %c0_5 = arith.constant 0 : index
    %22 = vector.load %arg2[%c1, %c0_4, %c0_5] : memref<3x64x2xf32, #tpu.memory_space<vmem>>, vector<1x64x2xf32>
    %23 = vector.shape_cast %22 : vector<1x64x2xf32> to vector<64x2xf32>
    %cst_6 = arith.constant dense<0.000000e+00> : vector<64x128xf32>
    %24 = tpu.matmul %23, %16, %cst_6 {dimension_numbers = #tpu.dot_dimension_numbers<[1], [0], [0], [1], [0, 0, 1, 1], [], []>} : vector<64x2xf32>, vector<2x128xf32>, vector<64x128xf32> -> vector<64x128xf32>
    %25 = arith.addf %21, %24 : vector<64x128xf32>
    %c2 = arith.constant 2 : index
    %c0_7 = arith.constant 0 : index
    %c0_8 = arith.constant 0 : index
    %26 = vector.load %arg2[%c2, %c0_7, %c0_8] : memref<3x64x2xf32, #tpu.memory_space<vmem>>, vector<1x64x2xf32>
    %27 = vector.shape_cast %26 : vector<1x64x2xf32> to vector<64x2xf32>
    %cst_9 = arith.constant dense<0.000000e+00> : vector<64x128xf32>
    %28 = tpu.matmul %27, %18, %cst_9 {dimension_numbers = #tpu.dot_dimension_numbers<[1], [0], [0], [1], [0, 0, 1, 1], [], []>} : vector<64x2xf32>, vector<2x128xf32>, vector<64x128xf32> -> vector<64x128xf32>
    %29 = arith.addf %25, %28 : vector<64x128xf32>
    %c0_10 = arith.constant 0 : index
    %c0_11 = arith.constant 0 : index
    %30 = vector.load %arg3[%c0_10, %c0_11] : memref<64x1xf32, #tpu.memory_space<vmem>>, vector<64x1xf32>
    %31 = vector.broadcast %30 : vector<64x1xf32> to vector<64x128xf32>
    %32 = arith.addf %29, %31 : vector<64x128xf32>
    %cst_12 = arith.constant 0.000000e+00 : f32
    %33 = vector.broadcast %cst_12 : f32 to vector<64x128xf32>
    %34 = arith.cmpf ogt, %32, %33 : vector<64x128xf32>
    %cst_13 = arith.constant 2.000000e-01 : f32
    %35 = vector.broadcast %cst_13 : f32 to vector<64x128xf32>
    %36 = arith.mulf %35, %32 : vector<64x128xf32>
    %37 = arith.select %34, %32, %36 : vector<64x128xi1>, vector<64x128xf32>
    %38 = vector.broadcast %13 : vector<1x128xf32> to vector<64x128xf32>
    %39 = arith.mulf %37, %38 : vector<64x128xf32>
    %c1_i32_14 = arith.constant 1 : i32
    %40 = tpu.dynamic_rotate %39 by %c1_i32_14 dim 1 : vector<64x128xf32>, i32 -> vector<64x128xf32>
    %c127_i32_15 = arith.constant 127 : i32
    %41 = tpu.dynamic_rotate %39 by %c127_i32_15 dim 1 : vector<64x128xf32>, i32 -> vector<64x128xf32>
    %c0_16 = arith.constant 0 : index
    %c0_17 = arith.constant 0 : index
    %c0_18 = arith.constant 0 : index
    %42 = vector.load %arg4[%c0_16, %c0_17, %c0_18] : memref<3x64x64xf32, #tpu.memory_space<vmem>>, vector<1x64x64xf32>
    %43 = vector.shape_cast %42 : vector<1x64x64xf32> to vector<64x64xf32>
    %cst_19 = arith.constant dense<0.000000e+00> : vector<64x128xf32>
    %44 = tpu.matmul %43, %40, %cst_19 {dimension_numbers = #tpu.dot_dimension_numbers<[1], [0], [0], [1], [0, 0, 1, 1], [], []>} : vector<64x64xf32>, vector<64x128xf32>, vector<64x128xf32> -> vector<64x128xf32>
    %c1_20 = arith.constant 1 : index
    %c0_21 = arith.constant 0 : index
    %c0_22 = arith.constant 0 : index
    %45 = vector.load %arg4[%c1_20, %c0_21, %c0_22] : memref<3x64x64xf32, #tpu.memory_space<vmem>>, vector<1x64x64xf32>
    %46 = vector.shape_cast %45 : vector<1x64x64xf32> to vector<64x64xf32>
    %cst_23 = arith.constant dense<0.000000e+00> : vector<64x128xf32>
    %47 = tpu.matmul %46, %39, %cst_23 {dimension_numbers = #tpu.dot_dimension_numbers<[1], [0], [0], [1], [0, 0, 1, 1], [], []>} : vector<64x64xf32>, vector<64x128xf32>, vector<64x128xf32> -> vector<64x128xf32>
    %48 = arith.addf %44, %47 : vector<64x128xf32>
    %c2_24 = arith.constant 2 : index
    %c0_25 = arith.constant 0 : index
    %c0_26 = arith.constant 0 : index
    %49 = vector.load %arg4[%c2_24, %c0_25, %c0_26] : memref<3x64x64xf32, #tpu.memory_space<vmem>>, vector<1x64x64xf32>
    %50 = vector.shape_cast %49 : vector<1x64x64xf32> to vector<64x64xf32>
    %cst_27 = arith.constant dense<0.000000e+00> : vector<64x128xf32>
    %51 = tpu.matmul %50, %41, %cst_27 {dimension_numbers = #tpu.dot_dimension_numbers<[1], [0], [0], [1], [0, 0, 1, 1], [], []>} : vector<64x64xf32>, vector<64x128xf32>, vector<64x128xf32> -> vector<64x128xf32>
    %52 = arith.addf %48, %51 : vector<64x128xf32>
    %c0_28 = arith.constant 0 : index
    %c0_29 = arith.constant 0 : index
    %53 = vector.load %arg5[%c0_28, %c0_29] : memref<64x1xf32, #tpu.memory_space<vmem>>, vector<64x1xf32>
    %54 = vector.broadcast %53 : vector<64x1xf32> to vector<64x128xf32>
    %55 = arith.addf %52, %54 : vector<64x128xf32>
    %cst_30 = arith.constant 0.000000e+00 : f32
    %56 = vector.broadcast %cst_30 : f32 to vector<64x128xf32>
    %57 = arith.cmpf ogt, %55, %56 : vector<64x128xf32>
    %cst_31 = arith.constant 2.000000e-01 : f32
    %58 = vector.broadcast %cst_31 : f32 to vector<64x128xf32>
    %59 = arith.mulf %58, %55 : vector<64x128xf32>
    %60 = arith.select %57, %55, %59 : vector<64x128xi1>, vector<64x128xf32>
    %61 = vector.broadcast %13 : vector<1x128xf32> to vector<64x128xf32>
    %62 = arith.mulf %60, %61 : vector<64x128xf32>
    %c1_i32_32 = arith.constant 1 : i32
    %63 = tpu.dynamic_rotate %62 by %c1_i32_32 dim 1 : vector<64x128xf32>, i32 -> vector<64x128xf32>
    %c127_i32_33 = arith.constant 127 : i32
    %64 = tpu.dynamic_rotate %62 by %c127_i32_33 dim 1 : vector<64x128xf32>, i32 -> vector<64x128xf32>
    %c0_34 = arith.constant 0 : index
    %c0_35 = arith.constant 0 : index
    %c0_36 = arith.constant 0 : index
    %65 = vector.load %arg6[%c0_34, %c0_35, %c0_36] : memref<3x2x64xf32, #tpu.memory_space<vmem>>, vector<1x2x64xf32>
    %66 = vector.shape_cast %65 : vector<1x2x64xf32> to vector<2x64xf32>
    %cst_37 = arith.constant dense<0.000000e+00> : vector<2x128xf32>
    %67 = tpu.matmul %66, %63, %cst_37 {dimension_numbers = #tpu.dot_dimension_numbers<[1], [0], [0], [1], [0, 0, 1, 1], [], []>} : vector<2x64xf32>, vector<64x128xf32>, vector<2x128xf32> -> vector<2x128xf32>
    %c1_38 = arith.constant 1 : index
    %c0_39 = arith.constant 0 : index
    %c0_40 = arith.constant 0 : index
    %68 = vector.load %arg6[%c1_38, %c0_39, %c0_40] : memref<3x2x64xf32, #tpu.memory_space<vmem>>, vector<1x2x64xf32>
    %69 = vector.shape_cast %68 : vector<1x2x64xf32> to vector<2x64xf32>
    %cst_41 = arith.constant dense<0.000000e+00> : vector<2x128xf32>
    %70 = tpu.matmul %69, %62, %cst_41 {dimension_numbers = #tpu.dot_dimension_numbers<[1], [0], [0], [1], [0, 0, 1, 1], [], []>} : vector<2x64xf32>, vector<64x128xf32>, vector<2x128xf32> -> vector<2x128xf32>
    %71 = arith.addf %67, %70 : vector<2x128xf32>
    %c2_42 = arith.constant 2 : index
    %c0_43 = arith.constant 0 : index
    %c0_44 = arith.constant 0 : index
    %72 = vector.load %arg6[%c2_42, %c0_43, %c0_44] : memref<3x2x64xf32, #tpu.memory_space<vmem>>, vector<1x2x64xf32>
    %73 = vector.shape_cast %72 : vector<1x2x64xf32> to vector<2x64xf32>
    %cst_45 = arith.constant dense<0.000000e+00> : vector<2x128xf32>
    %74 = tpu.matmul %73, %64, %cst_45 {dimension_numbers = #tpu.dot_dimension_numbers<[1], [0], [0], [1], [0, 0, 1, 1], [], []>} : vector<2x64xf32>, vector<64x128xf32>, vector<2x128xf32> -> vector<2x128xf32>
    %75 = arith.addf %71, %74 : vector<2x128xf32>
    %c0_46 = arith.constant 0 : index
    %c0_47 = arith.constant 0 : index
    %76 = vector.load %arg7[%c0_46, %c0_47] : memref<2x1xf32, #tpu.memory_space<vmem>>, vector<2x1xf32>
    %77 = vector.broadcast %76 : vector<2x1xf32> to vector<2x128xf32>
    %78 = arith.addf %75, %77 : vector<2x128xf32>
    %79 = math.tanh %78 : vector<2x128xf32>
    %80 = vector.broadcast %13 : vector<1x128xf32> to vector<2x128xf32>
    %81 = arith.mulf %79, %80 : vector<2x128xf32>
    %c1_i32_48 = arith.constant 1 : i32
    %82 = tpu.dynamic_rotate %62 by %c1_i32_48 dim 1 : vector<64x128xf32>, i32 -> vector<64x128xf32>
    %c127_i32_49 = arith.constant 127 : i32
    %83 = tpu.dynamic_rotate %62 by %c127_i32_49 dim 1 : vector<64x128xf32>, i32 -> vector<64x128xf32>
    %c0_50 = arith.constant 0 : index
    %c0_51 = arith.constant 0 : index
    %c0_52 = arith.constant 0 : index
    %84 = vector.load %arg8[%c0_50, %c0_51, %c0_52] : memref<3x2x64xf32, #tpu.memory_space<vmem>>, vector<1x2x64xf32>
    %85 = vector.shape_cast %84 : vector<1x2x64xf32> to vector<2x64xf32>
    %cst_53 = arith.constant dense<0.000000e+00> : vector<2x128xf32>
    %86 = tpu.matmul %85, %82, %cst_53 {dimension_numbers = #tpu.dot_dimension_numbers<[1], [0], [0], [1], [0, 0, 1, 1], [], []>} : vector<2x64xf32>, vector<64x128xf32>, vector<2x128xf32> -> vector<2x128xf32>
    %c1_54 = arith.constant 1 : index
    %c0_55 = arith.constant 0 : index
    %c0_56 = arith.constant 0 : index
    %87 = vector.load %arg8[%c1_54, %c0_55, %c0_56] : memref<3x2x64xf32, #tpu.memory_space<vmem>>, vector<1x2x64xf32>
    %88 = vector.shape_cast %87 : vector<1x2x64xf32> to vector<2x64xf32>
    %cst_57 = arith.constant dense<0.000000e+00> : vector<2x128xf32>
    %89 = tpu.matmul %88, %62, %cst_57 {dimension_numbers = #tpu.dot_dimension_numbers<[1], [0], [0], [1], [0, 0, 1, 1], [], []>} : vector<2x64xf32>, vector<64x128xf32>, vector<2x128xf32> -> vector<2x128xf32>
    %90 = arith.addf %86, %89 : vector<2x128xf32>
    %c2_58 = arith.constant 2 : index
    %c0_59 = arith.constant 0 : index
    %c0_60 = arith.constant 0 : index
    %91 = vector.load %arg8[%c2_58, %c0_59, %c0_60] : memref<3x2x64xf32, #tpu.memory_space<vmem>>, vector<1x2x64xf32>
    %92 = vector.shape_cast %91 : vector<1x2x64xf32> to vector<2x64xf32>
    %cst_61 = arith.constant dense<0.000000e+00> : vector<2x128xf32>
    %93 = tpu.matmul %92, %83, %cst_61 {dimension_numbers = #tpu.dot_dimension_numbers<[1], [0], [0], [1], [0, 0, 1, 1], [], []>} : vector<2x64xf32>, vector<64x128xf32>, vector<2x128xf32> -> vector<2x128xf32>
    %94 = arith.addf %90, %93 : vector<2x128xf32>
    %c0_62 = arith.constant 0 : index
    %c0_63 = arith.constant 0 : index
    %95 = vector.load %arg9[%c0_62, %c0_63] : memref<2x1xf32, #tpu.memory_space<vmem>>, vector<2x1xf32>
    %96 = vector.broadcast %95 : vector<2x1xf32> to vector<2x128xf32>
    %97 = arith.addf %94, %96 : vector<2x128xf32>
    %c0_64 = arith.constant 0 : index
    %c0_65 = arith.constant 0 : index
    %98 = vector.load %arg1[%c0_64, %c0_65] : memref<2x128xf32, #tpu.memory_space<vmem>>, vector<2x128xf32>
    %99 = math.exp %81 : vector<2x128xf32>
    %100 = arith.mulf %98, %99 : vector<2x128xf32>
    %101 = arith.addf %100, %97 : vector<2x128xf32>
    %c0_66 = arith.constant 0 : index
    %c0_67 = arith.constant 0 : index
    %102 = vector.load %arg10[%c0_66, %c0_67] : memref<2x128xf32, #tpu.memory_space<vmem>>, vector<2x128xf32>
    tpu.vector_store %arg10[%c0_66, %c0_67], %101 {strides = array<i32>} : memref<2x128xf32, #tpu.memory_space<vmem>>, vector<2x128xf32>,
    %cst_68 = arith.constant dense<0.000000e+00> : vector<128xf32>
    %103 = vector.multi_reduction <add>, %81, %cst_68 [0] : vector<2x128xf32> to vector<128xf32>
    %104 = vector.shape_cast %103 : vector<128xf32> to vector<1x128xf32>
    %105 = tpu.iota {dimensions = array<i32: 0>} : vector<128x2xi32>
    %106 = tpu.iota {dimensions = array<i32: 1>} : vector<128x2xi32>
    %c64_i32_69 = arith.constant 64 : i32
    %107 = vector.broadcast %c64_i32_69 : i32 to vector<128x2xi32>
    %108 = arith.muli %106, %107 : vector<128x2xi32>
    %109 = arith.cmpi sge, %105, %108 : vector<128x2xi32>
    %c64_i32_70 = arith.constant 64 : i32
    %110 = vector.broadcast %c64_i32_70 : i32 to vector<128x2xi32>
    %111 = arith.muli %106, %110 : vector<128x2xi32>
    %c64_i32_71 = arith.constant 64 : i32
    %112 = vector.broadcast %c64_i32_71 : i32 to vector<128x2xi32>
    %113 = arith.addi %111, %112 : vector<128x2xi32>
    %114 = arith.cmpi slt, %105, %113 : vector<128x2xi32>
    %115 = arith.andi %109, %114 : vector<128x2xi1>
    %116 = arith.extui %115 : vector<128x2xi1> to vector<128x2xi32>
    %117 = arith.sitofp %116 : vector<128x2xi32> to vector<128x2xf32>
    %cst_72 = arith.constant dense<0.000000e+00> : vector<1x2xf32>
    %118 = tpu.matmul %104, %117, %cst_72 {dimension_numbers = #tpu.dot_dimension_numbers<[1], [0], [0], [1], [0, 0, 1, 1], [], []>} : vector<1x128xf32>, vector<128x2xf32>, vector<1x2xf32> -> vector<1x2xf32>
    %c0_73 = arith.constant 0 : index
    %c0_74 = arith.constant 0 : index
    %119 = vector.load %arg11[%c0_73, %c0_74] : memref<1x2xf32, #tpu.memory_space<vmem>>, vector<1x2xf32>
    tpu.vector_store %arg11[%c0_73, %c0_74], %118 {strides = array<i32>} : memref<1x2xf32, #tpu.memory_space<vmem>>, vector<1x2xf32>,
    return
  }
}

</mosaic_0001>

<bundles_post_ra>
// kernel: coupling_forward.1
= control target key start
LH: loop header
LB: loop body
LE: loop exit
PB: predicated region body
PF: predicated region fallthrough
CT: control target
= control target key end

     0   :  { %v38_v0 = vlaneseq  ;;  %vm72_vm0 = vcmask 15360   ;;  %v2399_v5 = vmov 0.0   ;;  %vm97_vm6 = vcmask 1041408   ;;  %s3065_s0 = inlined_call_operand.vmem [shape: f32[2,128], index: 0, kind: input, shape index: {}]   ;;  %s3066_s1 = inlined_call_operand.vmem [shape: f32[2,128], index: 1, kind: input, shape index: {}]   ;;  %s3067_s2 = inlined_call_operand.vmem [shape: f32[3,64,2], index: 2, kind: input, shape index: {}]   ;;  %s3068_s3 = inlined_call_operand.vmem [shape: f32[64,1], index: 3, kind: input, shape index: {}]   ;;  %s3069_s4 = inlined_call_operand.vmem [shape: f32[3,64,64], index: 4, kind: input, shape index: {}]   ;;  %s3070_s5 = inlined_call_operand.vmem [shape: f32[64,1], index: 5, kind: input, shape index: {}]   ;;  %s3071_s6 = inlined_call_operand.vmem [shape: f32[3,2,64], index: 6, kind: input, shape index: {}]   ;;  %s3072_s7 = inlined_call_operand.vmem [shape: f32[2,1], index: 7, kind: input, shape index: {}]   ;;  %s3073_s8 = inlined_call_operand.vmem [shape: f32[3,2,64], index: 8, kind: input, shape index: {}]   ;;  %s3074_s9 = inlined_call_operand.vmem [shape: f32[2,1], index: 9, kind: input, shape index: {}]   ;;  %s3075_s10 = inlined_call_operand.vmem [shape: f32[2,128], index: 10, kind: output, shape index: {0}]   ;;  %s3076_s11 = inlined_call_operand.hbm [shape: f32[1,2], index: 11, kind: output, shape index: {1}]  }
   0x1   :  { %v1818_v1 = vld [vmem:[%s3067_s2 + $0x40] sm:$0xff]  ;;  %v1819_v8 = vld [vmem:[%s3067_s2 + $0x48] sm:$0xff] }
   0x2   :  { %v2470_v2 = vand.u32 127, %v38_v0  ;;  %2091 = vmatprep.mubr.msk.f32.mxu1 %vm72_vm0, %v1818_v1  ;;  %v49_v3 = vld [vmem:[%s3065_s0] sm:$0x3] }
   0x3   :  { %v1844_v4 = vld [vmem:[%s3067_s2 + $0x80] sm:$0xff] }
   0x4   :  { %vm41_vm1 = vcmp.lt.s32.totalorder %v2470_v2, 16  ;;  %vm43_vm2 = vcmp.ge.s32.totalorder %v2470_v2, 64  ;;  %vm44_vm3 = vcmp.lt.s32.totalorder %v2470_v2, 80  ;;  %2119 = vmatprep.mubr.msk.f32.mxu0 %vm72_vm0, %v1844_v4 }
   0x5   :  { %vm45_vm4 = vmand %vm43_vm2, %vm44_vm3 }
   0x6   :  { %vm46_vm5 = vmor %vm41_vm1, %vm45_vm4 }
   0x7   :  { %v2484_v6 = vsel %vm46_vm5, 1.0, %v2399_v5 }
   0x8   :  { %v50_v7 = vmul.f32 %v2484_v6, %v49_v3 }
   0x9   :  { %17 = vsyncpa [#allocation3], 0  ;;  %s2400_s0 = smov 1   ;;  %v1820_v9 = vld [vmem:[%s3067_s2 + $0x50] sm:$0xff]  ;;  %v1821_v10 = vld [vmem:[%s3067_s2 + $0x58] sm:$0xff]  ;;  %s2401_s29 = smov 127  }
   0xa   :  { %51 = vrot.lane.b32.xlu0 %v50_v7, %s2400_s0  ;;  %2089 = vmatprep.subr.msk.mxu1 %vm97_vm6, %v50_v7  ;;  %v1822_v11 = vld [vmem:[%s3067_s2 + $0x60] sm:$0xff]  ;;  %v494_v12 = vld [vmem:[%s3068_s3 + $0x38] sm:$0xff]  ;;  %v2402_v13 = vmov 0   ;;  %v492_v14 = vld [vmem:[%s3068_s3 + $0x28] sm:$0xff]  ;;  %vm624_vm12 = vcmask 523264   ;;  %vm2403_vm4 = vmmov 0  }
   0xb   :  { %2090 = vmatpush3.msk.msra.mxu1 %vm97_vm6, %v50_v7  ;;  %2371 = vset.pattern.permute.xlu1 %v2402_v13  ;;  %v1823_v15 = vld [vmem:[%s3067_s2 + $0x68] sm:$0xff]  ;;  %v1824_v16 = vld [vmem:[%s3067_s2 + $0x70] sm:$0xff]  ;;  %v1825_v19 = vld [vmem:[%s3067_s2 + $0x78] sm:$0xff] }
   0xc   :  { %2092 = vmatmul.mubr.msk.f32.vlgmr.msra.gmra.mxu1 %vm72_vm0, %v1819_v8  ;;  %532 = vperm.xlu1 %2371, %v494_v12   ;;  %v493_v17 = vld [vmem:[%s3068_s3 + $0x30] sm:$0xff]  ;;  %v55_v20 = vld [vmem:[%s3067_s2] sm:$0xff]  ;;  %v490_v23 = vld [vmem:[%s3068_s3 + $0x18] sm:$0xff] }
   0xd   :  { %2094 = vmatprep.mubr.msk.f32.mxu1 %vm72_vm0, %v1820_v9  ;;  %2372 = vset.pattern.permute.xlu0 %v2402_v13  ;;  %v489_v18 = vld [vmem:[%s3068_s3 + $0x10] sm:$0xff]  ;;  %v491_v21 = vld [vmem:[%s3068_s3 + $0x20] sm:$0xff]  ;;  %v488_v24 = vld [vmem:[%s3068_s3 + $0x8] sm:$0xff] }
   0xe   :  { %53 = vrot.lane.b32.xlu0 %v50_v7, %s2401_s29  ;;  %v487_v22 = vld [vmem:[%s3068_s3] sm:$0xff]  ;;  %v56_v26 = vld [vmem:[%s3067_s2 + $0x8] sm:$0xff]  ;;  %v57_v27 = vld [vmem:[%s3067_s2 + $0x10] sm:$0xff]  ;;  %s2405_s3 = smov [#allocation2]  }
   0xf   :  { %v58_v29 = vld [vmem:[%s3067_s2 + $0x18] sm:$0xff]  ;;  %v1845_v30 = vld [vmem:[%s3067_s2 + $0x88] sm:$0xff]  ;;  %v59_v31 = vld [vmem:[%s3067_s2 + $0x20] sm:$0xff] }
  0x10   :  { %2095 = vmatmul.mubr.msk.f32.gmra.mxu1 %vm72_vm0, %v1821_v10  ;;  %527 = vperm.xlu1 %2371, %v493_v17   ;;  %v1846_v32 = vld [vmem:[%s3067_s2 + $0x90] sm:$0xff]  ;;  %v60_v33 = vld [vmem:[%s3067_s2 + $0x28] sm:$0xff]  ;;  %v1847_v34 = vld [vmem:[%s3067_s2 + $0x98] sm:$0xff] }
  0x11   :  { %2097 = vmatprep.mubr.msk.f32.mxu1 %vm72_vm0, %v1822_v11  ;;  %v61_v35 = vld [vmem:[%s3067_s2 + $0x30] sm:$0xff]  ;;  %v1848_v36 = vld [vmem:[%s3067_s2 + $0xa0] sm:$0xff]  ;;  %v62_v37 = vld [vmem:[%s3067_s2 + $0x38] sm:$0xff] }
  0x12   :  { %522 = vperm.xlu0 %2372, %v492_v14   ;;  %v1849_v38 = vld [vmem:[%s3067_s2 + $0xa8] sm:$0xff]  ;;  %v1850_v39 = vld [vmem:[%s3067_s2 + $0xb0] sm:$0xff]  ;;  %v1851_v40 = vld [vmem:[%s3067_s2 + $0xb8] sm:$0xff] }
  0x14   :  { %2098 = vmatmul.mubr.msk.f32.gmra.mxu1 %vm72_vm0, %v1823_v15  ;;  %517 = vperm.xlu1 %2371, %v491_v21  }
  0x15   :  { %2100 = vmatprep.mubr.msk.f32.mxu1 %vm72_vm0, %v1824_v16 }
  0x16   :  { %507 = vperm.xlu0 %2372, %v489_v18  }
  0x18   :  { %2101 = vmatmul.mubr.msk.f32.gmra.mxu1 %vm72_vm0, %v1825_v19  ;;  %512 = vperm.xlu1 %2371, %v490_v23  }
  0x19   :  { %2105 = vmatprep.mubr.msk.f32.mxu1 %vm72_vm0, %v55_v20 }
  0x1a   :  { %497 = vperm.xlu0 %2372, %v487_v22  }
  0x1c   :  { %502 = vperm.xlu1 %2371, %v488_v24  }
  0x7c   :  { %v52_v25 = vpop.permute.xlu0 %51 }
  0x7d   :  { %2103 = vmatprep.subr.msk.mxu1 %vm97_vm6, %v52_v25 }
  0x7e   :  { %2104 = vmatpush3.msk.msra.mxu1 %vm97_vm6, %v52_v25 }
  0x7f   :  { %2106 = vmatmul.mubr.msk.f32.vlgmr.msra.gmra.mxu1 %vm72_vm0, %v56_v26 }
  0x80   :  { %v54_v28 = vpop.permute.xlu0 %53  ;;  %2108 = vmatprep.mubr.msk.f32.mxu1 %vm72_vm0, %v57_v27 }
  0x81   :  { %2117 = vmatprep.subr.msk.mxu0 %vm97_vm6, %v54_v28 }
  0x82   :  { %2118 = vmatpush3.msk.msra.mxu0 %vm97_vm6, %v54_v28 }
  0x83   :  { %2109 = vmatmul.mubr.msk.f32.gmra.mxu1 %vm72_vm0, %v58_v29  ;;  %2120 = vmatmul.mubr.msk.f32.vlgmr.msra.gmra.mxu0 %vm72_vm0, %v1845_v30 }
  0x84   :  { %2111 = vmatprep.mubr.msk.f32.mxu1 %vm72_vm0, %v59_v31  ;;  %2122 = vmatprep.mubr.msk.f32.mxu0 %vm72_vm0, %v1846_v32 }
  0x87   :  { %2112 = vmatmul.mubr.msk.f32.gmra.mxu1 %vm72_vm0, %v60_v33  ;;  %2123 = vmatmul.mubr.msk.f32.gmra.mxu0 %vm72_vm0, %v1847_v34  ;;  %v533_v47 = vpop.permute.xlu1 %532 }
  0x88   :  { %2114 = vmatprep.mubr.msk.f32.mxu1 %vm72_vm0, %v61_v35  ;;  %2125 = vmatprep.mubr.msk.f32.mxu0 %vm72_vm0, %v1848_v36 }
  0x8b   :  { %2115 = vmatmul.mubr.msk.f32.gmra.mxu1 %vm72_vm0, %v62_v37  ;;  %2126 = vmatmul.mubr.msk.f32.gmra.mxu0 %vm72_vm0, %v1849_v38  ;;  %v528_v50 = vpop.permute.xlu1 %527 }
  0x8c   :  { %2128 = vmatprep.mubr.msk.f32.mxu0 %vm72_vm0, %v1850_v39 }
  0x8d   :  { %v523_v9 = vpop.permute.xlu0 %522 }
  0x8f   :  { %2129 = vmatmul.mubr.msk.f32.gmra.mxu0 %vm72_vm0, %v1851_v40  ;;  %v518_v53 = vpop.permute.xlu1 %517 }
  0x91   :  { %v508_v31 = vpop.permute.xlu0 %507 }
  0x93   :  { %v513_v61 = vpop.permute.xlu1 %512 }
  0xcc   :  { %v2093_v41 = vpop.f32.mrf.mxu1 }
  0xce   :  { %v167_v42 = vpop.f32.mrf.mxu1 }
  0xd0   :  { %v2096_v43 = vpop.f32.mrf.mxu1 }
  0xd2   :  { %v177_v44 = vpop.f32.mrf.mxu1 }
  0xd4   :  { %v2099_v45 = vpop.f32.mrf.mxu1 }
  0xd6   :  { %v187_v46 = vpop.f32.mrf.mxu1 }
  0xd8   :  { %v2102_v48 = vpop.f32.mrf.mxu1 }
  0xda   :  { %v197_v49 = vpop.f32.mrf.mxu1 }
 0x13f   :  { %v2107_v51 = vpop.f32.mrf.mxu1 }
 0x140   :  { %v305_v30 = vadd.f32 %v2107_v51, %v2093_v41 }
 0x141   :  { %v299_v52 = vpop.f32.mrf.mxu1 }
 0x142   :  { %v300_v36 = vadd.f32 %v299_v52, %v167_v42 }
 0x143   :  { %v2121_v54 = vpop.f32.mrf.mxu0  ;;  %v2110_v55 = vpop.f32.mrf.mxu1 }
 0x144   :  { %v315_v58 = vadd.f32 %v2110_v55, %v2096_v43  ;;  %v480_v37 = vadd.f32 %v2121_v54, %v305_v30 }
 0x145   :  { %v309_v56 = vpop.f32.mrf.mxu1  ;;  %v440_v57 = vpop.f32.mrf.mxu0 }
 0x146   :  { %v310_v24 = vadd.f32 %v309_v56, %v177_v44  ;;  %v1861_v44 = vld [vmem:[%s3069_s4 + $0x40] sm:$0xff]  ;;  %v479_v42 = vadd.f32 %v440_v57, %v300_v36 }
 0x147   :  { %v2124_v59 = vpop.f32.mrf.mxu0  ;;  %v2113_v60 = vpop.f32.mrf.mxu1  ;;  %2147 = vmatprep.mubr.msk.f32.mxu1 %vm624_vm12, %v1861_v44  ;;  %v607_v57 = vld [vmem:[%s3069_s4] sm:$0xff]  ;;  %v613_v44 = vld [vmem:[%s3069_s4 + $0x30] sm:$0xff] }
 0x148   :  { %v482_v62 = vadd.f32 %v2124_v59, %v315_v58  ;;  %v325_v4 = vadd.f32 %v2113_v60, %v2099_v45  ;;  %2175 = vmatprep.mubr.msk.f32.mxu0 %vm624_vm12, %v607_v57  ;;  %v611_v36 = vld [vmem:[%s3069_s4 + $0x20] sm:$0xff] }
 0x149   :  { %v319_v63 = vpop.f32.mrf.mxu1  ;;  %v450_v1 = vpop.f32.mrf.mxu0 }
 0x14a   :  { %v538_v3 = vadd.f32 %v513_v61, %v482_v62  ;;  %v320_v11 = vadd.f32 %v319_v63, %v187_v46  ;;  %v481_v32 = vadd.f32 %v450_v1, %v310_v24  ;;  %v1862_v63 = vld [vmem:[%s3069_s4 + $0x48] sm:$0xff]  ;;  %v1863_v1 = vld [vmem:[%s3069_s4 + $0x50] sm:$0xff] }
 0x14b   :  { %v2116_v7 = vpop.f32.mrf.mxu1  ;;  %v2127_v8 = vpop.f32.mrf.mxu0 }
 0x14c   :  { %vm546_vm7 = vcmp.gt.f32.partialorder %v538_v3, 0.0  ;;  %v554_v10 = vmul.f32 0.2, %v538_v3  ;;  %v484_v12 = vadd.f32 %v2127_v8, %v325_v4  ;;  %v335_v16 = vadd.f32 %v2116_v7, %v2102_v48  ;;  %v498_v48 = vpop.permute.xlu0 %497  ;;  %v1865_v4 = vld [vmem:[%s3069_s4 + $0x60] sm:$0xff]  ;;  %v1866_v7 = vld [vmem:[%s3069_s4 + $0x68] sm:$0xff]  ;;  %v1035_v8 = vld [vmem:[%s3070_s5 + $0x30] sm:$0xff] }
 0x14d   :  { %v329_v13 = vpop.f32.mrf.mxu1  ;;  %v460_v14 = vpop.f32.mrf.mxu0  ;;  %v537_v41 = vadd.f32 %v508_v31, %v481_v32  ;;  %v608_v32 = vld [vmem:[%s3069_s4 + $0x8] sm:$0xff] }
 0x14e   :  { %v562_v15 = vsel %vm546_vm7, %v538_v3, %v554_v10  ;;  %v483_v17 = vadd.f32 %v460_v14, %v320_v11  ;;  %v540_v18 = vadd.f32 %v523_v9, %v484_v12  ;;  %v330_v21 = vadd.f32 %v329_v13, %v197_v49  ;;  %v1864_v3 = vld [vmem:[%s3069_s4 + $0x58] sm:$0xff]  ;;  %v1867_v9 = vld [vmem:[%s3069_s4 + $0x70] sm:$0xff]  ;;  %v1033_v12 = vld [vmem:[%s3070_s5 + $0x20] sm:$0xff] }
 0x14f   :  { %v2130_v19 = vpop.f32.mrf.mxu0  ;;  %v2608_v20 = vmul.f32 %v2484_v6, %v562_v15  ;;  %v553_v52 = vmul.f32 0.2, %v537_v41  ;;  %vm545_vm13 = vcmp.gt.f32.partialorder %v537_v41, 0.0  ;;  %v1036_v10 = vld [vmem:[%s3070_s5 + $0x38] sm:$0xff]  ;;  %v1885_v13 = vld [vmem:[%s3069_s4 + $0x80] sm:$0xff]  ;;  %v1034_v14 = vld [vmem:[%s3070_s5 + $0x28] sm:$0xff] }
 0x150   :  { %v539_v22 = vadd.f32 %v518_v53, %v483_v17  ;;  %v486_v23 = vadd.f32 %v2130_v19, %v335_v16  ;;  %vm548_vm8 = vcmp.gt.f32.partialorder %v540_v18, 0.0  ;;  %v556_v25 = vmul.f32 0.2, %v540_v18  ;;  %v1868_v11 = vld [vmem:[%s3069_s4 + $0x78] sm:$0xff]  ;;  %v1031_v15 = vld [vmem:[%s3070_s5 + $0x10] sm:$0xff]  ;;  %v1029_v17 = vld [vmem:[%s3070_s5] sm:$0xff] }
 0x151   :  { %v470_v26 = vpop.f32.mrf.mxu0  ;;  %581 = vrot.lane.b32.xlu0 %v2608_v20, %s2400_s0  ;;  %v535_v53 = vadd.f32 %v498_v48, %v479_v42  ;;  %v561_v55 = vsel %vm545_vm13, %v537_v41, %v553_v52  ;;  %v1032_v16 = vld [vmem:[%s3070_s5 + $0x18] sm:$0xff]  ;;  %v1889_v42 = vld [vmem:[%s3069_s4 + $0xa0] sm:$0xff] }
 0x152   :  { %vm547_vm9 = vcmp.gt.f32.partialorder %v539_v22, 0.0  ;;  %v555_v27 = vmul.f32 0.2, %v539_v22  ;;  %v542_v28 = vadd.f32 %v533_v47, %v486_v23  ;;  %v485_v29 = vadd.f32 %v470_v26, %v330_v21  ;;  %v503_v47 = vpop.permute.xlu1 %502  ;;  %v1888_v41 = vld [vmem:[%s3069_s4 + $0x98] sm:$0xff] }
 0x153   :  { %v564_v33 = vsel %vm548_vm8, %v540_v18, %v556_v25  ;;  %v536_v51 = vadd.f32 %v503_v47, %v480_v37  ;;  %v551_v56 = vmul.f32 0.2, %v535_v53  ;;  %vm543_vm15 = vcmp.gt.f32.partialorder %v535_v53, 0.0  ;;  %v1030_v18 = vld [vmem:[%s3070_s5 + $0x8] sm:$0xff]  ;;  %v1891_v47 = vld [vmem:[%s3069_s4 + $0xb0] sm:$0xff]  ;;  %v1892_v48 = vld [vmem:[%s3069_s4 + $0xb8] sm:$0xff] }
 0x154   :  { %vm550_vm10 = vcmp.gt.f32.partialorder %v542_v28, 0.0  ;;  %v558_v34 = vmul.f32 0.2, %v542_v28  ;;  %v541_v35 = vadd.f32 %v528_v50, %v485_v29  ;;  %v563_v38 = vsel %vm547_vm9, %v539_v22, %v555_v27  ;;  %s1807_s5 = sshll.u32 %s2405_s3, 4  ;;  %s1808_s5 = int_to_ptr.vmem [resolvable:$true] %s1807_s5 }
 0x155   :  { %v572_v39 = vmul.f32 %v2484_v6, %v564_v33  ;;  %v571_v49 = vmul.f32 %v2484_v6, %v563_v38  ;;  %v552_v54 = vmul.f32 0.2, %v536_v51  ;;  %vm544_vm14 = vcmp.gt.f32.partialorder %v536_v51, 0.0  ;;  %v609_v33 = vld [vmem:[%s3069_s4 + $0x10] sm:$0xff]  ;;  %s2377_s23 = scalar_lea.vmem %s1808_s5, 16  ;;  %p2382_p1 = scmp.lt.s32.totalorder %s1808_s5, %s1808_s5 }
 0x156   :  { %v566_v40 = vsel %vm550_vm10, %v542_v28, %v558_v34  ;;  %vm549_vm11 = vcmp.gt.f32.partialorder %v541_v35, 0.0  ;;  %v557_v43 = vmul.f32 0.2, %v541_v35  ;;  %v569_v59 = vmul.f32 %v2484_v6, %v561_v55  ;;  %p2378_p0 = scmp.ne.s32.totalorder %s1808_s5, %s2377_s23 }
 0x157   :  { %601 = vrot.lane.b32.xlu1 %v572_v39, %s2401_s29  ;;  %585 = vrot.lane.b32.xlu0 %v572_v39, %s2400_s0  ;;  %v574_v45 = vmul.f32 %v2484_v6, %v566_v40  ;;  %v560_v58 = vsel %vm544_vm14, %v536_v51, %v552_v54  ;;  %v559_v60 = vsel %vm543_vm15, %v535_v53, %v551_v56  ;;  %v612_v40 = vld [vmem:[%s3069_s4 + $0x28] sm:$0xff] }
 0x158   :  { %v565_v46 = vsel %vm549_vm11, %v541_v35, %v557_v43  ;;  %v568_v61 = vmul.f32 %v2484_v6, %v560_v58  ;;  %v567_v62 = vmul.f32 %v2484_v6, %v559_v60  ;;  %v610_v35 = vld [vmem:[%s3069_s4 + $0x18] sm:$0xff]  ;;  %v1887_v43 = vld [vmem:[%s3069_s4 + $0x90] sm:$0xff] }
 0x159   :  { %2131 = vmatprep.subr.mxu1 %v574_v45  ;;  %v573_v50 = vmul.f32 %v2484_v6, %v565_v46  ;;  %v1890_v46 = vld [vmem:[%s3069_s4 + $0xa8] sm:$0xff] }
 0x15a   :  { %2132 = vmatpush3.msra.mxu1 %v574_v45 }
 0x15b   :  { %599 = vrot.lane.b32.xlu1 %v571_v49, %s2401_s29  ;;  %583 = vrot.lane.b32.xlu0 %v571_v49, %s2400_s0 }
 0x15c   :  { %2133 = vmatprep.subr.mxu1 %v573_v50 }
 0x15d   :  { %2134 = vmatpush3.msra.mxu1 %v573_v50 }
 0x15e   :  { %2135 = vmatprep.subr.mxu1 %v572_v39 }
 0x15f   :  { %589 = vrot.lane.b32.xlu1 %v574_v45, %s2400_s0  ;;  %587 = vrot.lane.b32.xlu0 %v573_v50, %s2400_s0 }
 0x160   :  { %2136 = vmatpush3.msra.mxu1 %v572_v39  ;;  %v1886_v39 = vld [vmem:[%s3069_s4 + $0x88] sm:$0xff] }
 0x161   :  { %2137 = vmatprep.subr.mxu1 %v571_v49 }
 0x162   :  { %2138 = vmatpush3.msra.mxu1 %v571_v49 }
 0x163   :  { %605 = vrot.lane.b32.xlu1 %v574_v45, %s2401_s29  ;;  %2139 = vmatprep.subr.mxu1 %v2608_v20  ;;  %v614_v45 = vld [vmem:[%s3069_s4 + $0x38] sm:$0xff] }
 0x164   :  { %579 = vrot.lane.b32.xlu0 %v569_v59, %s2400_s0  ;;  %2140 = vmatpush3.msra.mxu1 %v2608_v20 }
 0x165   :  { %2141 = vmatprep.subr.mxu1 %v569_v59 }
 0x166   :  { %2142 = vmatpush3.msra.mxu1 %v569_v59 }
 0x167   :  { %603 = vrot.lane.b32.xlu1 %v573_v50, %s2401_s29  ;;  %2143 = vmatprep.subr.mxu1 %v568_v61 }
 0x168   :  { %577 = vrot.lane.b32.xlu0 %v568_v61, %s2400_s0  ;;  %2144 = vmatpush3.msra.mxu1 %v568_v61 }
 0x169   :  { %2145 = vmatprep.subr.mxu1 %v567_v62 }
 0x16a   :  { %2146 = vmatpush3.msra.mxu1 %v567_v62 }
 0x16b   :  { %597 = vrot.lane.b32.xlu1 %v2608_v20, %s2401_s29  ;;  %2148 = vmatmul.mubr.msk.f32.vlgmr.msra.gmra.mxu1 %vm624_vm12, %v1862_v63 }
 0x16c   :  { %575 = vrot.lane.b32.xlu0 %v567_v62, %s2400_s0  ;;  %2150 = vmatprep.mubr.msk.f32.mxu1 %vm624_vm12, %v1863_v1 }
 0x16f   :  { %595 = vrot.lane.b32.xlu1 %v569_v59, %s2401_s29  ;;  %2151 = vmatmul.mubr.msk.f32.gmra.mxu1 %vm624_vm12, %v1864_v3 }
 0x170   :  { %591 = vrot.lane.b32.xlu0 %v567_v62, %s2401_s29  ;;  %2153 = vmatprep.mubr.msk.f32.mxu1 %vm624_vm12, %v1865_v4 }
 0x173   :  { %593 = vrot.lane.b32.xlu1 %v568_v61, %s2401_s29  ;;  %2154 = vmatmul.mubr.msk.f32.gmra.mxu1 %vm624_vm12, %v1866_v7 }
 0x174   :  { %1069 = vperm.xlu0 %2372, %v1035_v8   ;;  %2156 = vmatprep.mubr.msk.f32.mxu1 %vm624_vm12, %v1867_v9 }
 0x177   :  { %1074 = vperm.xlu1 %2371, %v1036_v10   ;;  %2157 = vmatmul.mubr.msk.f32.gmra.mxu1 %vm624_vm12, %v1868_v11 }
 0x178   :  { %1059 = vperm.xlu0 %2372, %v1033_v12   ;;  %2203 = vmatprep.mubr.msk.f32.mxu1 %vm624_vm12, %v1885_v13 }
 0x17b   :  { %1064 = vperm.xlu1 %2371, %v1034_v14  }
 0x17c   :  { %1049 = vperm.xlu0 %2372, %v1031_v15  }
 0x17f   :  { %1054 = vperm.xlu1 %2371, %v1032_v16  }
 0x180   :  { %1039 = vperm.xlu0 %2372, %v1029_v17  }
 0x183   :  { %1044 = vperm.xlu1 %2371, %v1030_v18  }
 0x1c3   :  { %v582_v19 = vpop.permute.xlu0 %581 }
 0x1c9   :  { %v602_v20 = vpop.permute.xlu1 %601  ;;  %v586_v21 = vpop.permute.xlu0 %585 }
 0x1cd   :  { %v600_v22 = vpop.permute.xlu1 %599  ;;  %v584_v23 = vpop.permute.xlu0 %583 }
 0x1d1   :  { %v590_v24 = vpop.permute.xlu1 %589  ;;  %v588_v25 = vpop.permute.xlu0 %587 }
 0x1d2   :  { %2159 = vmatprep.subr.mxu0 %v590_v24 }
 0x1d3   :  { %2160 = vmatpush3.msra.mxu0 %v590_v24 }
 0x1d4   :  { %2161 = vmatprep.subr.mxu0 %v588_v25 }
 0x1d5   :  { %v606_v26 = vpop.permute.xlu1 %605  ;;  %2162 = vmatpush3.msra.mxu0 %v588_v25 }
 0x1d6   :  { %v580_v27 = vpop.permute.xlu0 %579  ;;  %2163 = vmatprep.subr.mxu0 %v586_v21  ;;  %2187 = vmatprep.subr.mxu1 %v606_v26 }
 0x1d7   :  { %2164 = vmatpush3.msra.mxu0 %v586_v21  ;;  %2188 = vmatpush3.msra.mxu1 %v606_v26 }
 0x1d8   :  { %2165 = vmatprep.subr.mxu0 %v584_v23 }
 0x1d9   :  { %v604_v28 = vpop.permute.xlu1 %603  ;;  %2166 = vmatpush3.msra.mxu0 %v584_v23 }
 0x1da   :  { %v578_v29 = vpop.permute.xlu0 %577  ;;  %2167 = vmatprep.subr.mxu0 %v582_v19  ;;  %2189 = vmatprep.subr.mxu1 %v604_v28 }
 0x1db   :  { %2168 = vmatpush3.msra.mxu0 %v582_v19  ;;  %2190 = vmatpush3.msra.mxu1 %v604_v28 }
 0x1dc   :  { %2169 = vmatprep.subr.mxu0 %v580_v27  ;;  %2191 = vmatprep.subr.mxu1 %v602_v20 }
 0x1dd   :  { %v598_v30 = vpop.permute.xlu1 %597  ;;  %2170 = vmatpush3.msra.mxu0 %v580_v27  ;;  %2192 = vmatpush3.msra.mxu1 %v602_v20 }
 0x1de   :  { %2171 = vmatprep.subr.mxu0 %v578_v29  ;;  %2193 = vmatprep.subr.mxu1 %v600_v22  ;;  %v576_v31 = vpop.permute.xlu0 %575 }
 0x1df   :  { %2172 = vmatpush3.msra.mxu0 %v578_v29  ;;  %2194 = vmatpush3.msra.mxu1 %v600_v22 }
 0x1e0   :  { %2173 = vmatprep.subr.mxu0 %v576_v31  ;;  %2195 = vmatprep.subr.mxu1 %v598_v30 }
 0x1e1   :  { %v596_v34 = vpop.permute.xlu1 %595  ;;  %2174 = vmatpush3.msra.mxu0 %v576_v31  ;;  %2196 = vmatpush3.msra.mxu1 %v598_v30 }
 0x1e2   :  { %2197 = vmatprep.subr.mxu1 %v596_v34  ;;  %2176 = vmatmul.mubr.msk.f32.vlgmr.msra.gmra.mxu0 %vm624_vm12, %v608_v32  ;;  %v592_v38 = vpop.permute.xlu0 %591 }
 0x1e3   :  { %2198 = vmatpush3.msra.mxu1 %v596_v34  ;;  %2178 = vmatprep.mubr.msk.f32.mxu0 %vm624_vm12, %v609_v33 }
 0x1e4   :  { %2215 = vmatprep.subr.mxu0 %v2399_v5 }
 0x1e5   :  { %v594_v37 = vpop.permute.xlu1 %593 }
 0x1e6   :  { %2199 = vmatprep.subr.mxu1 %v594_v37  ;;  %2179 = vmatmul.mubr.msk.f32.gmra.mxu0 %vm624_vm12, %v610_v35 }
 0x1e7   :  { %2200 = vmatpush3.msra.mxu1 %v594_v37  ;;  %2181 = vmatprep.mubr.msk.f32.mxu0 %vm624_vm12, %v611_v36 }
 0x1e8   :  { %2201 = vmatprep.subr.mxu1 %v592_v38 }
 0x1e9   :  { %2202 = vmatpush3.msra.mxu1 %v592_v38 }
 0x1ea   :  { %2204 = vmatmul.mubr.msk.f32.vlgmr.msra.gmra.mxu1 %vm624_vm12, %v1886_v39  ;;  %2182 = vmatmul.mubr.msk.f32.gmra.mxu0 %vm624_vm12, %v612_v40 }
 0x1eb   :  { %2206 = vmatprep.mubr.msk.f32.mxu1 %vm624_vm12, %v1887_v43  ;;  %2184 = vmatprep.mubr.msk.f32.mxu0 %vm624_vm12, %v613_v44 }
 0x1ec   :  { %2234 = vmatprep.subr.mxu1 %v2399_v5 }
 0x1ee   :  { %2207 = vmatmul.mubr.msk.f32.gmra.mxu1 %vm624_vm12, %v1888_v41  ;;  %2185 = vmatmul.mubr.msk.f32.gmra.mxu0 %vm624_vm12, %v614_v45 }
 0x1ef   :  { %2209 = vmatprep.mubr.msk.f32.mxu1 %vm624_vm12, %v1889_v42  ;;  %v1070_v9 = vpop.permute.xlu0 %1069  ;;  %2231 = vmatprep.mubr.msk.f32.mxu0 %vm2403_vm4, %v2399_v5 }
 0x1f2   :  { %2210 = vmatmul.mubr.msk.f32.gmra.mxu1 %vm624_vm12, %v1890_v46  ;;  %v1075_v56 = vpop.permute.xlu1 %1074 }
 0x1f3   :  { %2212 = vmatprep.mubr.msk.f32.mxu1 %vm624_vm12, %v1891_v47  ;;  %v1060_v21 = vpop.permute.xlu0 %1059 }
 0x1f6   :  { %2213 = vmatmul.mubr.msk.f32.gmra.mxu1 %vm624_vm12, %v1892_v48  ;;  %v1065_v62 = vpop.permute.xlu1 %1064 }
 0x1f7   :  { %v1050_v44 = vpop.permute.xlu0 %1049  ;;  %2250 = vmatprep.mubr.msk.f32.mxu1 %vm2403_vm4, %v2399_v5 }
 0x1fa   :  { %v1055_v11 = vpop.permute.xlu1 %1054 }
 0x22b   :  { %v2149_v49 = vpop.f32.mrf.mxu1 }
 0x22d   :  { %v715_v50 = vpop.f32.mrf.mxu1 }
 0x22f   :  { %v2152_v51 = vpop.f32.mrf.mxu1 }
 0x231   :  { %v725_v52 = vpop.f32.mrf.mxu1 }
 0x233   :  { %v2155_v53 = vpop.f32.mrf.mxu1 }
 0x235   :  { %v735_v54 = vpop.f32.mrf.mxu1 }
 0x237   :  { %v2158_v57 = vpop.f32.mrf.mxu1 }
 0x239   :  { %v745_v60 = vpop.f32.mrf.mxu1 }
 0x2a2   :  { %v2177_v55 = vpop.f32.mrf.mxu0 }
 0x2a3   :  { %v850_v39 = vadd.f32 %v2177_v55, %v2149_v49 }
 0x2a4   :  { %v844_v58 = vpop.f32.mrf.mxu0 }
 0x2a5   :  { %v845_v41 = vadd.f32 %v844_v58, %v715_v50  ;;  %v1040_v58 = vpop.permute.xlu0 %1039 }
 0x2a6   :  { %v2180_v59 = vpop.f32.mrf.mxu0 }
 0x2a7   :  { %v860_v4 = vadd.f32 %v2180_v59, %v2152_v51 }
 0x2a8   :  { %v854_v61 = vpop.f32.mrf.mxu0 }
 0x2a9   :  { %v855_v27 = vadd.f32 %v854_v61, %v725_v52 }
 0x2aa   :  { %v2205_v63 = vpop.f32.mrf.mxu1  ;;  %v2183_v1 = vpop.f32.mrf.mxu0 }
 0x2ab   :  { %v870_v13 = vadd.f32 %v2183_v1, %v2155_v53  ;;  %v1022_v46 = vadd.f32 %v2205_v63, %v850_v39 }
 0x2ac   :  { %v982_v3 = vpop.f32.mrf.mxu1  ;;  %v864_v7 = vpop.f32.mrf.mxu0 }
 0x2ad   :  { %v865_v18 = vadd.f32 %v864_v7, %v735_v54  ;;  %v1021_v49 = vadd.f32 %v982_v3, %v845_v41  ;;  %v1045_v54 = vpop.permute.xlu1 %1044 }
 0x2ae   :  { %v2208_v8 = vpop.f32.mrf.mxu1  ;;  %v2186_v15 = vpop.f32.mrf.mxu0  ;;  %v1078_v55 = vadd.f32 %v1045_v54, %v1022_v46 }
 0x2af   :  { %v1024_v10 = vadd.f32 %v2208_v8, %v860_v4  ;;  %v880_v23 = vadd.f32 %v2186_v15, %v2158_v57 }
 0x2b0   :  { %v992_v12 = vpop.f32.mrf.mxu1  ;;  %v874_v25 = vpop.f32.mrf.mxu0  ;;  %v1094_v61 = vmul.f32 0.2, %v1078_v55  ;;  %vm1086_vm8 = vcmp.gt.f32.partialorder %v1078_v55, 0.0 }
 0x2b1   :  { %v1080_v14 = vadd.f32 %v1055_v11, %v1024_v10  ;;  %v1023_v33 = vadd.f32 %v992_v12, %v855_v27  ;;  %v875_v34 = vadd.f32 %v874_v25, %v745_v60  ;;  %v1077_v60 = vadd.f32 %v1040_v58, %v1021_v49  ;;  %v1608_v10 = vld [vmem:[%s3074_s9] sm:$0x3] }
 0x2b2   :  { %v2211_v16 = vpop.f32.mrf.mxu1  ;;  %v1102_v3 = vsel %vm1086_vm8, %v1078_v55, %v1094_v61  ;;  %v1374_v11 = vld [vmem:[%s3072_s7] sm:$0x3] }
 0x2b3   :  { %vm1088_vm0 = vcmp.gt.f32.partialorder %v1080_v14, 0.0  ;;  %v1096_v17 = vmul.f32 0.2, %v1080_v14  ;;  %v1026_v19 = vadd.f32 %v2211_v16, %v870_v13  ;;  %v1079_v47 = vadd.f32 %v1050_v44, %v1023_v33  ;;  %v1149_v25 = vld [vmem:[%s3071_s6] sm:$0x3] }
 0x2b4   :  { %v1002_v20 = vpop.f32.mrf.mxu1  ;;  %v1093_v63 = vmul.f32 0.2, %v1077_v60  ;;  %vm1085_vm9 = vcmp.gt.f32.partialorder %v1077_v60, 0.0  ;;  %v2811_v7 = vmul.f32 %v2484_v6, %v1102_v3  ;;  %v2963_v33 = vshrl.u32 %v38_v0, 7 }
 0x2b5   :  { %v1104_v22 = vsel %vm1088_vm0, %v1080_v14, %v1096_v17  ;;  %v1082_v24 = vadd.f32 %v1065_v62, %v1026_v19  ;;  %v1025_v26 = vadd.f32 %v1002_v20, %v865_v18  ;;  %vm1087_vm7 = vcmp.gt.f32.partialorder %v1079_v47, 0.0 }
 0x2b6   :  { %v2214_v28 = vpop.f32.mrf.mxu1  ;;  %v2760_v29 = vmul.f32 %v2484_v6, %v1104_v22  ;;  %v1101_v4 = vsel %vm1085_vm9, %v1077_v60, %v1093_v63  ;;  %v2404_v0 = vmov 1.0   ;;  %v1639_v44 = vadd.s32 80, %v2963_v33 }
 0x2b7   :  { %vm1090_vm1 = vcmp.gt.f32.partialorder %v1082_v24, 0.0  ;;  %v1098_v30 = vmul.f32 0.2, %v1082_v24  ;;  %v1081_v31 = vadd.f32 %v1060_v21, %v1025_v26  ;;  %v1028_v32 = vadd.f32 %v2214_v28, %v880_v23  ;;  %v1904_v28 = vld [vmem:[%s3071_s6 + $0x4] sm:$0x3] }
 0x2b8   :  { %1123 = vrot.lane.b32.xlu0 %v2760_v29, %s2400_s0  ;;  %v1012_v35 = vpop.f32.mrf.mxu1  ;;  %v2820_v8 = vmul.f32 %v2484_v6, %v1101_v4  ;;  %v1638_v41 = vadd.s32 72, %v2963_v33  ;;  %v1635_v46 = vadd.s32 48, %v2963_v33  ;;  %v1632_v49 = vadd.s32 24, %v2963_v33 }
 0x2b9   :  { %v1106_v36 = vsel %vm1090_vm1, %v1082_v24, %v1098_v30  ;;  %vm1089_vm2 = vcmp.gt.f32.partialorder %v1081_v31, 0.0  ;;  %v1097_v37 = vmul.f32 0.2, %v1081_v31  ;;  %v1084_v38 = vadd.f32 %v1075_v56, %v1028_v32  ;;  %v1909_v32 = vld [vmem:[%s3073_s8 + $0x4] sm:$0x3] }
 0x2ba   :  { %v1027_v40 = vadd.f32 %v1012_v35, %v875_v34  ;;  %v2765_v43 = vmul.f32 %v2484_v6, %v1106_v36  ;;  %v1095_v56 = vmul.f32 0.2, %v1079_v47  ;;  %v2966_v34 = vmul.u32 64, %v2470_v2 }
 0x2bb   :  { %v1105_v45 = vsel %vm1089_vm2, %v1081_v31, %v1097_v37  ;;  %vm1092_vm3 = vcmp.gt.f32.partialorder %v1084_v38, 0.0  ;;  %v1100_v42 = vmul.f32 0.2, %v1084_v38  ;;  %v1383_v31 = vld [vmem:[%s3073_s8] sm:$0x3]  ;;  %v1644_v35 = vadd.s32 120, %v2963_v33 }
 0x2bc   :  { %v1083_v48 = vadd.f32 %v1070_v9, %v1027_v40  ;;  %1143 = vrot.lane.b32.xlu1 %v2765_v43, %s2401_s29  ;;  %1127 = vrot.lane.b32.xlu0 %v2765_v43, %s2400_s0  ;;  %v2776_v52 = vmul.f32 %v2484_v6, %v1105_v45  ;;  %v1103_v62 = vsel %vm1087_vm7, %v1079_v47, %v1095_v56  ;;  %v1901_v9 = vld [vmem:[%s3071_s6 + $0x2] sm:$0x3]  ;;  %v2970_v36 = vadd.s32 64, %v2966_v34 }
 0x2bd   :  { %v1108_v50 = vsel %vm1092_vm3, %v1084_v38, %v1100_v42  ;;  %v2800_v1 = vmul.f32 %v2484_v6, %v1103_v62  ;;  %vm1661_vm10 = vcmp.ge.s32.totalorder %v1644_v35, %v2966_v34  ;;  %v1643_v38 = vadd.s32 112, %v2963_v33 }
 0x2be   :  { %vm1091_vm5 = vcmp.gt.f32.partialorder %v1083_v48, 0.0  ;;  %v1099_v51 = vmul.f32 0.2, %v1083_v48  ;;  %v2779_v53 = vmul.f32 %v2484_v6, %v1108_v50  ;;  %vm1678_vm11 = vcmp.lt.s32.totalorder %v1644_v35, %v2970_v36 }
 0x2bf   :  { %vm1660_vm13 = vcmp.ge.s32.totalorder %v1643_v38, %v2966_v34  ;;  %vm1677_vm14 = vcmp.lt.s32.totalorder %v1643_v38, %v2970_v36  ;;  %v1642_v2 = vadd.s32 104, %v2963_v33  ;;  %v1641_v40 = vadd.s32 96, %v2963_v33 }
 0x2c0   :  { %v1107_v57 = vsel %vm1091_vm5, %v1083_v48, %v1099_v51  ;;  %1141 = vrot.lane.b32.xlu1 %v2776_v52, %s2401_s29  ;;  %1125 = vrot.lane.b32.xlu0 %v2776_v52, %s2400_s0  ;;  %vm1693_vm15 = vmand %vm1660_vm13, %vm1677_vm14  ;;  %vm1655_vm13 = vcmp.ge.s32.totalorder %v1638_v41, %v2966_v34  ;;  %vm1672_vm14 = vcmp.lt.s32.totalorder %v1638_v41, %v2970_v36  ;;  %v1637_v45 = vadd.s32 64, %v2963_v33 }
 0x2c1   :  { %2216 = vmatpush3.msra.mxu0 %v2779_v53  ;;  %v2787_v59 = vmul.f32 %v2484_v6, %v1107_v57  ;;  %vm1659_vm0 = vcmp.ge.s32.totalorder %v1642_v2, %v2966_v34  ;;  %vm1676_vm1 = vcmp.lt.s32.totalorder %v1642_v2, %v2970_v36  ;;  %vm1658_vm3 = vcmp.ge.s32.totalorder %v1641_v40, %v2966_v34 }
 0x2c2   :  { %2217 = vmatprep.subr.mxu0 %v2399_v5  ;;  %vm1692_vm2 = vmand %vm1659_vm0, %vm1676_vm1  ;;  %vm1654_vm0 = vcmp.ge.s32.totalorder %v1637_v45, %v2966_v34  ;;  %vm1671_vm1 = vcmp.lt.s32.totalorder %v1637_v45, %v2970_v36  ;;  %v1636_v42 = vadd.s32 56, %v2963_v33  ;;  %v1634_v47 = vadd.s32 40, %v2963_v33 }
 0x2c3   :  { %2218 = vmatpush3.msra.mxu0 %v2787_v59  ;;  %v1633_v48 = vadd.s32 32, %v2963_v33  ;;  %v1631_v50 = vadd.s32 16, %v2963_v33  ;;  %v1630_v51 = vadd.s32 8, %v2963_v33 }
 0x2c4   :  { %2219 = vmatprep.subr.mxu0 %v2399_v5  ;;  %1131 = vrot.lane.b32.xlu1 %v2779_v53, %s2400_s0 }
 0x2c5   :  { %1129 = vrot.lane.b32.xlu0 %v2787_v59, %s2400_s0  ;;  %2220 = vmatpush3.msra.mxu0 %v2765_v43 }
 0x2c6   :  { %2221 = vmatprep.subr.mxu0 %v2399_v5 }
 0x2c7   :  { %2222 = vmatpush3.msra.mxu0 %v2776_v52 }
 0x2c8   :  { %2223 = vmatprep.subr.mxu0 %v2399_v5  ;;  %1147 = vrot.lane.b32.xlu1 %v2779_v53, %s2401_s29 }
 0x2c9   :  { %1121 = vrot.lane.b32.xlu0 %v2800_v1, %s2400_s0  ;;  %2224 = vmatpush3.msra.mxu0 %v2760_v29 }
 0x2ca   :  { %2225 = vmatprep.subr.mxu0 %v2399_v5 }
 0x2cb   :  { %2226 = vmatpush3.msra.mxu0 %v2800_v1 }
 0x2cc   :  { %2227 = vmatprep.subr.mxu0 %v2399_v5  ;;  %1145 = vrot.lane.b32.xlu1 %v2787_v59, %s2401_s29 }
 0x2cd   :  { %1119 = vrot.lane.b32.xlu0 %v2811_v7, %s2400_s0  ;;  %2228 = vmatpush3.msra.mxu0 %v2811_v7 }
 0x2ce   :  { %2229 = vmatprep.subr.mxu0 %v2399_v5 }
 0x2cf   :  { %2230 = vmatpush3.msra.mxu0 %v2820_v8 }
 0x2d0   :  { %1139 = vrot.lane.b32.xlu1 %v2760_v29, %s2401_s29  ;;  %2253 = vmatprep.subr.mxu0 %v2399_v5 }
 0x2d1   :  { %1117 = vrot.lane.b32.xlu0 %v2820_v8, %s2400_s0  ;;  %2232 = vmatmul.mubr.msk.f32.vlgmr.msra.gmra.mxu0 %vm624_vm12, %v1901_v9 }
 0x2d2   :  { %2269 = vmatprep.mubr.msk.f32.mxu0 %vm2403_vm4, %v2399_v5 }
 0x2d4   :  { %1137 = vrot.lane.b32.xlu1 %v2800_v1, %s2401_s29 }
 0x2d5   :  { %1133 = vrot.lane.b32.xlu0 %v2820_v8, %s2401_s29 }
 0x2d8   :  { %1135 = vrot.lane.b32.xlu1 %v2811_v7, %s2401_s29 }
 0x2d9   :  { %1611 = vperm.xlu0 %2372, %v1608_v10  }
 0x2dc   :  { %1377 = vperm.xlu1 %2371, %v1374_v11  }
 0x32a   :  { %v2847_v12 = vpop.permute.xlu0 %1123 }
 0x32e   :  { %v2849_v13 = vpop.permute.xlu1 %1143  ;;  %v2851_v14 = vpop.permute.xlu0 %1127 }
 0x332   :  { %v2853_v15 = vpop.permute.xlu1 %1141  ;;  %v2855_v16 = vpop.permute.xlu0 %1125 }
 0x336   :  { %v1132_v17 = vpop.permute.xlu1 %1131 }
 0x337   :  { %v1130_v18 = vpop.permute.xlu0 %1129  ;;  %2235 = vmatpush3.msra.mxu1 %v1132_v17 }
 0x338   :  { %2236 = vmatprep.subr.mxu1 %v2399_v5 }
 0x339   :  { %2237 = vmatpush3.msra.mxu1 %v1130_v18 }
 0x33a   :  { %v2858_v19 = vpop.permute.xlu1 %1147  ;;  %2238 = vmatprep.subr.mxu1 %v2399_v5 }
 0x33b   :  { %v2861_v20 = vpop.permute.xlu0 %1121  ;;  %2239 = vmatpush3.msra.mxu1 %v2851_v14  ;;  %2254 = vmatpush3.msra.mxu0 %v2858_v19 }
 0x33c   :  { %2240 = vmatprep.subr.mxu1 %v2399_v5  ;;  %2255 = vmatprep.subr.mxu0 %v2399_v5 }
 0x33d   :  { %2241 = vmatpush3.msra.mxu1 %v2855_v16 }
 0x33e   :  { %v2868_v21 = vpop.permute.xlu1 %1145  ;;  %2242 = vmatprep.subr.mxu1 %v2399_v5 }
 0x33f   :  { %v2871_v22 = vpop.permute.xlu0 %1119  ;;  %2243 = vmatpush3.msra.mxu1 %v2847_v12  ;;  %2256 = vmatpush3.msra.mxu0 %v2868_v21 }
 0x340   :  { %2244 = vmatprep.subr.mxu1 %v2399_v5  ;;  %2257 = vmatprep.subr.mxu0 %v2399_v5 }
 0x341   :  { %2245 = vmatpush3.msra.mxu1 %v2861_v20  ;;  %2258 = vmatpush3.msra.mxu0 %v2849_v13 }
 0x342   :  { %v2879_v23 = vpop.permute.xlu1 %1139  ;;  %2246 = vmatprep.subr.mxu1 %v2399_v5  ;;  %2259 = vmatprep.subr.mxu0 %v2399_v5 }
 0x343   :  { %2247 = vmatpush3.msra.mxu1 %v2871_v22  ;;  %2260 = vmatpush3.msra.mxu0 %v2853_v15  ;;  %v1118_v24 = vpop.permute.xlu0 %1117 }
 0x344   :  { %2248 = vmatprep.subr.mxu1 %v2399_v5  ;;  %2261 = vmatprep.subr.mxu0 %v2399_v5 }
 0x345   :  { %2249 = vmatpush3.msra.mxu1 %v1118_v24  ;;  %2262 = vmatpush3.msra.mxu0 %v2879_v23 }
 0x346   :  { %v1138_v26 = vpop.permute.xlu1 %1137  ;;  %2272 = vmatprep.subr.mxu1 %v2399_v5  ;;  %2263 = vmatprep.subr.mxu0 %v2399_v5 }
 0x347   :  { %2251 = vmatmul.mubr.msk.f32.vlgmr.msra.gmra.mxu1 %vm624_vm12, %v1149_v25  ;;  %2264 = vmatpush3.msra.mxu0 %v1138_v26  ;;  %v1134_v30 = vpop.permute.xlu0 %1133 }
 0x348   :  { %2273 = vmatpush3.msra.mxu1 %v2779_v53  ;;  %2265 = vmatprep.subr.mxu0 %v2399_v5 }
 0x349   :  { %2274 = vmatprep.subr.mxu1 %v2399_v5  ;;  %2288 = vmatprep.mubr.msk.f32.mxu1 %vm2403_vm4, %v2399_v5 }
 0x34a   :  { %2275 = vmatpush3.msra.mxu1 %v2787_v59  ;;  %v1136_v27 = vpop.permute.xlu1 %1135 }
 0x34b   :  { %2276 = vmatprep.subr.mxu1 %v2399_v5  ;;  %2266 = vmatpush3.msra.mxu0 %v1136_v27 }
 0x34c   :  { %2277 = vmatpush3.msra.mxu1 %v2765_v43  ;;  %2267 = vmatprep.subr.mxu0 %v2399_v5  ;;  %v1640_v43 = vadd.s32 88, %v2963_v33 }
 0x34d   :  { %2278 = vmatprep.subr.mxu1 %v2399_v5  ;;  %2268 = vmatpush3.msra.mxu0 %v1134_v30 }
 0x34e   :  { %2279 = vmatpush3.msra.mxu1 %v2776_v52  ;;  %2270 = vmatmul.mubr.msk.f32.vlgmr.msra.gmra.mxu0 %vm624_vm12, %v1904_v28  ;;  %vm1657_vm7 = vcmp.ge.s32.totalorder %v1640_v43, %v2966_v34  ;;  %vm1674_vm8 = vcmp.lt.s32.totalorder %v1640_v43, %v2970_v36 }
 0x34f   :  { %2280 = vmatprep.subr.mxu1 %v2399_v5  ;;  %2291 = vmatprep.subr.mxu0 %v2399_v5  ;;  %vm1690_vm9 = vmand %vm1657_vm7, %vm1674_vm8  ;;  %vm1652_vm7 = vcmp.ge.s32.totalorder %v1635_v46, %v2966_v34  ;;  %vm1669_vm8 = vcmp.lt.s32.totalorder %v1635_v46, %v2970_v36 }
 0x350   :  { %2281 = vmatpush3.msra.mxu1 %v2760_v29  ;;  %2292 = vmatpush3.msra.mxu0 %v1132_v17  ;;  %v1906_v29 = vld [vmem:[%s3073_s8 + $0x2] sm:$0x3]  ;;  %v1615_v17 = vld [vmem:[%s3066_s1] sm:$0x3]  ;;  %s2381_s1 = scalar_lea.vmem %s1808_s5, 32 }
 0x351   :  { %2282 = vmatprep.subr.mxu1 %v2399_v5  ;;  %2293 = vmatprep.subr.mxu0 %v2399_v5  ;;  %p2383_p2 = scmp.lt.s32.totalorder %s2381_s1, %s2377_s23 }
 0x352   :  { %2283 = vmatpush3.msra.mxu1 %v2800_v1  ;;  %2294 = vmatpush3.msra.mxu0 %v1130_v18 }
 0x353   :  { %2284 = vmatprep.subr.mxu1 %v2399_v5  ;;  %2295 = vmatprep.subr.mxu0 %v2399_v5  ;;  %p2384_p3 = por %p2383_p2, %p2382_p1 }
 0x354   :  { %2285 = vmatpush3.msra.mxu1 %v2811_v7  ;;  %2296 = vmatpush3.msra.mxu0 %v2851_v14  ;;  %v1612_v18 = vpop.permute.xlu0 %1611 }
 0x355   :  { %2286 = vmatprep.subr.mxu1 %v2399_v5  ;;  %2297 = vmatprep.subr.mxu0 %v2399_v5  ;;  %p2385_p4 = pnand %p2384_p3, %p2378_p0 }
 0x356   :  { %2287 = vmatpush3.msra.mxu1 %v2820_v8  ;;  %2298 = vmatpush3.msra.mxu0 %v2855_v16 }
 0x357   :  { %2299 = vmatprep.subr.mxu0 %v2399_v5  ;;  %2310 = vmatprep.subr.mxu1 %v2399_v5  ;;  %v1378_v57 = vpop.permute.xlu1 %1377 }
 0x358   :  { %2289 = vmatmul.mubr.msk.f32.vlgmr.msra.gmra.mxu1 %vm624_vm12, %v1906_v29  ;;  %2300 = vmatpush3.msra.mxu0 %v2847_v12 }
 0x359   :  { %2311 = vmatpush3.msra.mxu1 %v2858_v19  ;;  %2301 = vmatprep.subr.mxu0 %v2399_v5 }
 0x35a   :  { %2312 = vmatprep.subr.mxu1 %v2399_v5  ;;  %2302 = vmatpush3.msra.mxu0 %v2861_v20 }
 0x35b   :  { %2313 = vmatpush3.msra.mxu1 %v2868_v21  ;;  %2303 = vmatprep.subr.mxu0 %v2399_v5 }
 0x35c   :  { %2314 = vmatprep.subr.mxu1 %v2399_v5  ;;  %2304 = vmatpush3.msra.mxu0 %v2871_v22 }
 0x35d   :  { %2315 = vmatpush3.msra.mxu1 %v2849_v13  ;;  %2305 = vmatprep.subr.mxu0 %v2399_v5 }
 0x35e   :  { %2316 = vmatprep.subr.mxu1 %v2399_v5  ;;  %2306 = vmatpush3.msra.mxu0 %v1118_v24 }
 0x35f   :  { %2317 = vmatpush3.msra.mxu1 %v2853_v15  ;;  %2307 = vmatprep.mubr.msk.f32.mxu0 %vm2403_vm4, %v2399_v5 }
 0x360   :  { %2318 = vmatprep.subr.mxu1 %v2399_v5  ;;  %2308 = vmatmul.mubr.msk.f32.vlgmr.msra.gmra.mxu0 %vm624_vm12, %v1383_v31 }
 0x361   :  { %2319 = vmatpush3.msra.mxu1 %v2879_v23  ;;  %2326 = vmatprep.mubr.msk.f32.mxu1 %vm2403_vm4, %v2399_v5 }
 0x362   :  { %2320 = vmatprep.subr.mxu1 %v2399_v5  ;;  %2329 = vmatprep.subr.mxu0 %v2399_v5 }
 0x363   :  { %2321 = vmatpush3.msra.mxu1 %v1138_v26  ;;  %2361 = vmatprep.mubr.msk.f32.mxu0 %vm2403_vm4, %v2399_v5  ;;  %vm1675_vm4 = vcmp.lt.s32.totalorder %v1641_v40, %v2970_v36 }
 0x364   :  { %2322 = vmatprep.subr.mxu1 %v2399_v5  ;;  %vm1691_vm5 = vmand %vm1658_vm3, %vm1675_vm4  ;;  %vm1653_vm3 = vcmp.ge.s32.totalorder %v1636_v42, %v2966_v34  ;;  %vm1670_vm4 = vcmp.lt.s32.totalorder %v1636_v42, %v2970_v36 }
 0x365   :  { %2323 = vmatpush3.msra.mxu1 %v1136_v27 }
 0x366   :  { %2324 = vmatprep.subr.mxu1 %v2399_v5 }
 0x367   :  { %2325 = vmatpush3.msra.mxu1 %v1134_v30 }
 0x368   :  { %2327 = vmatmul.mubr.msk.f32.vlgmr.msra.gmra.mxu1 %vm624_vm12, %v1909_v32  ;;  %vm1694_vm12 = vmand %vm1661_vm10, %vm1678_vm11  ;;  %vm1656_vm10 = vcmp.ge.s32.totalorder %v1639_v44, %v2966_v34  ;;  %vm1673_vm11 = vcmp.lt.s32.totalorder %v1639_v44, %v2970_v36 }
 0x369   :  { %2330 = vmatpush3.msk.msra.mxu0 %vm1694_vm12, %v2404_v0  ;;  %vm1689_vm12 = vmand %vm1656_vm10, %vm1673_vm11  ;;  %vm1651_vm10 = vcmp.ge.s32.totalorder %v1634_v47, %v2966_v34  ;;  %vm1668_vm11 = vcmp.lt.s32.totalorder %v1634_v47, %v2970_v36 }
 0x36a   :  { %2331 = vmatprep.subr.mxu0 %v2399_v5 }
 0x36b   :  { %2332 = vmatpush3.msk.msra.mxu0 %vm1693_vm15, %v2404_v0  ;;  %vm1688_vm15 = vmand %vm1655_vm13, %vm1672_vm14  ;;  %vm1650_vm13 = vcmp.ge.s32.totalorder %v1633_v48, %v2966_v34  ;;  %vm1667_vm14 = vcmp.lt.s32.totalorder %v1633_v48, %v2970_v36 }
 0x36c   :  { %2333 = vmatprep.subr.mxu0 %v2399_v5 }
 0x36d   :  { %2334 = vmatpush3.msk.msra.mxu0 %vm1692_vm2, %v2404_v0  ;;  %vm1687_vm2 = vmand %vm1654_vm0, %vm1671_vm1  ;;  %vm1649_vm0 = vcmp.ge.s32.totalorder %v1632_v49, %v2966_v34  ;;  %vm1666_vm1 = vcmp.lt.s32.totalorder %v1632_v49, %v2970_v36 }
 0x36e   :  { %2335 = vmatprep.subr.mxu0 %v2399_v5 }
 0x36f   :  { %2336 = vmatpush3.msk.msra.mxu0 %vm1691_vm5, %v2404_v0  ;;  %vm1686_vm5 = vmand %vm1653_vm3, %vm1670_vm4  ;;  %vm1648_vm3 = vcmp.ge.s32.totalorder %v1631_v50, %v2966_v34  ;;  %vm1665_vm4 = vcmp.lt.s32.totalorder %v1631_v50, %v2970_v36 }
 0x370   :  { %2337 = vmatprep.subr.mxu0 %v2399_v5 }
 0x371   :  { %2338 = vmatpush3.msk.msra.mxu0 %vm1690_vm9, %v2404_v0  ;;  %vm1685_vm9 = vmand %vm1652_vm7, %vm1669_vm8  ;;  %vm1647_vm7 = vcmp.ge.s32.totalorder %v1630_v51, %v2966_v34  ;;  %vm1664_vm8 = vcmp.lt.s32.totalorder %v1630_v51, %v2970_v36 }
 0x372   :  { %2339 = vmatprep.subr.mxu0 %v2399_v5 }
 0x373   :  { %2340 = vmatpush3.msk.msra.mxu0 %vm1689_vm12, %v2404_v0  ;;  %vm1684_vm12 = vmand %vm1651_vm10, %vm1668_vm11  ;;  %vm1646_vm10 = vcmp.ge.s32.totalorder %v2963_v33, %v2966_v34  ;;  %vm1663_vm11 = vcmp.lt.s32.totalorder %v2963_v33, %v2970_v36 }
 0x374   :  { %2341 = vmatprep.subr.mxu0 %v2399_v5 }
 0x375   :  { %2342 = vmatpush3.msk.msra.mxu0 %vm1688_vm15, %v2404_v0  ;;  %vm1683_vm15 = vmand %vm1650_vm13, %vm1667_vm14 }
 0x376   :  { %2343 = vmatprep.subr.mxu0 %v2399_v5 }
 0x377   :  { %2344 = vmatpush3.msk.msra.mxu0 %vm1687_vm2, %v2404_v0  ;;  %vm1682_vm2 = vmand %vm1649_vm0, %vm1666_vm1 }
 0x378   :  { %2345 = vmatprep.subr.mxu0 %v2399_v5 }
 0x379   :  { %2346 = vmatpush3.msk.msra.mxu0 %vm1686_vm5, %v2404_v0  ;;  %vm1681_vm5 = vmand %vm1648_vm3, %vm1665_vm4 }
 0x37a   :  { %2347 = vmatprep.subr.mxu0 %v2399_v5 }
 0x37b   :  { %2348 = vmatpush3.msk.msra.mxu0 %vm1685_vm9, %v2404_v0  ;;  %vm1680_vm9 = vmand %vm1647_vm7, %vm1664_vm8 }
 0x37c   :  { %2349 = vmatprep.subr.mxu0 %v2399_v5 }
 0x37d   :  { %2350 = vmatpush3.msk.msra.mxu0 %vm1684_vm12, %v2404_v0  ;;  %vm1679_vm12 = vmand %vm1646_vm10, %vm1663_vm11 }
 0x37e   :  { %2351 = vmatprep.subr.mxu0 %v2399_v5 }
 0x37f   :  { %2352 = vmatpush3.msk.msra.mxu0 %vm1683_vm15, %v2404_v0 }
 0x380   :  { %2353 = vmatprep.subr.mxu0 %v2399_v5 }
 0x381   :  { %2354 = vmatpush3.msk.msra.mxu0 %vm1682_vm2, %v2404_v0 }
 0x382   :  { %2355 = vmatprep.subr.mxu0 %v2399_v5 }
 0x383   :  { %2356 = vmatpush3.msk.msra.mxu0 %vm1681_vm5, %v2404_v0 }
 0x384   :  { %2357 = vmatprep.subr.mxu0 %v2399_v5 }
 0x385   :  { %2358 = vmatpush3.msk.msra.mxu0 %vm1680_vm9, %v2404_v0 }
 0x386   :  { %2359 = vmatprep.subr.mxu0 %v2399_v5 }
 0x387   :  { %2360 = vmatpush3.msk.msra.mxu0 %vm1679_vm12, %v2404_v0 }
 0x391   :  { %v2972_v37 = vpop.f32.mrf.mxu0 }
 0x393   :  { %v2233_v39 = vpop.f32.mrf.mxu0 }
 0x407   :  { %v1294_v52 = vpop.f32.mrf.mxu1 }
 0x408   :  { %v1295_v54 = vadd.f32 %v1294_v52, %v2972_v37 }
 0x409   :  { %v2252_v53 = vpop.f32.mrf.mxu1 }
 0x40e   :  { %v1369_v55 = vpop.f32.mrf.mxu0 }
 0x40f   :  { %v1373_v56 = vadd.f32 %v1369_v55, %v1295_v54 }
 0x410   :  { %v2271_v58 = vpop.f32.mrf.mxu0 }
 0x411   :  { %v1380_v59 = vadd.f32 %v1378_v57, %v1373_v56 }
 0x413   :  { %2373 = vtanh.f32 %v1380_v59 }
 0x418   :  { %v1455_v60 = vpop.f32.mrf.mxu1 }
 0x41a   :  { %v2290_v61 = vpop.f32.mrf.mxu1 }
 0x420   :  { %v2374_v62 = vpop.eup %2373  ;;  %v1528_v63 = vpop.f32.mrf.mxu0 }
 0x421   :  { %v1382_v1 = vmul.f32 %v2374_v62, %v2484_v6  ;;  %v1529_v13 = vadd.f32 %v1528_v63, %v1455_v60 }
 0x422   :  { %v2309_v5 = vpop.f32.mrf.mxu0 }
 0x423   :  { %v1616_v3 = vmul.f32 1.442695, %v1382_v1  ;;  %v1621_v4 = vsel %vm97_vm6, %v1382_v1, 0.0  ;;  %vm1797_vm6 = vcmask 8192  }
 0x424   :  { %v1622_v7 = vrot.slane %v1621_v4, 4 }
 0x425   :  { %2375 = vpow2.f32 %v1616_v3 }
 0x426   :  { %v1623_v8 = vadd.f32 %v1622_v7, %v1621_v4 }
 0x428   :  { %v1603_v9 = vpop.f32.mrf.mxu1  ;;  %v1624_v10 = vrot.slane %v1623_v8, 2 }
 0x429   :  { %v1607_v16 = vadd.f32 %v1603_v9, %v1529_v13 }
 0x42a   :  { %v1625_v11 = vadd.f32 %v1624_v10, %v1623_v8  ;;  %v2328_v12 = vpop.f32.mrf.mxu1 }
 0x42b   :  { %v1614_v19 = vadd.f32 %v1612_v18, %v1607_v16 }
 0x42c   :  { %v1626_v14 = vrot.slane %v1625_v11, 1 }
 0x42e   :  { %v1627_v15 = vadd.f32 %v1626_v14, %v1625_v11 }
 0x430   :  { %2362 = vmatmul.mubr.f32.vlgmr.msra.gmra.mxu0 %v1627_v15 }
 0x432   :  { %v2376_v6 = vpop.eup %2375 }
 0x433   :  { %v1618_v20 = vmul.f32 %v2376_v6, %v1615_v17 }
 0x435   :  { %v1619_v21 = vadd.f32 %v1618_v20, %v1614_v19 }
 0x437   :  { %1620 = vst [vmem:[%s3075_s10] sm:$0x3] %v1619_v21 }
 0x4f0   :  { %v1793_v22 = vpop.f32.mrf.mxu0 }
 0x4f1   :  { %1798 = vst.msk [vmem:[#allocation2] sm:$0x1] %vm1797_vm6, %v1793_v22 }
 0x4f2   :  { %v2363_v23 = vpop.f32.mrf.mxu0 }
 0x4f3   :  { %2388 = shalt.err (!%p2385_p4)
}
 0x4f4   :  { %1810 = dma.vmem_to_hbm [thread:$0]  %s1808_s5, 16, %s3076_s11, [#allocation3]  }
 0x4f5   :  { %2397 = dma.done.wait [#allocation3], 16  }
 0x4f6   :  { %2398 = vsyncadd [#allocation3], 4294967280 }
 0x4f7   :  { %1816 = vsyncpa [#allocation3], 1 }

</bundles_post_ra>
